<compile_context>
chip_gen: v7x
topology: tpu7x:2x2x1
jax: 0.10.0
libtpu: 0.0.40
codegen_flags: <defaults>
</compile_context>

<pallas_src>
import functools

import jax
import jax.numpy as jnp
from jax.experimental import pallas as pl


def _fused_mlp_kernel(x_ref,
                      w1_ref, g1_ref, be1_ref,
                      w2_ref, g2_ref, be2_ref,
                      w3_ref, g3_ref, be3_ref,
                      o_ref, *, eps):
    def linear_bn(h, w_ref, g_ref, beta_ref, relu):
        # Linear (bias omitted: cancels exactly under training-mode BN).
        y = jnp.dot(h, w_ref[...], preferred_element_type=jnp.float32)  # (N, Dout)
        n = y.shape[0]
        inv_n = 1.0 / n
        # One-pass batch statistics (biased variance, matches PyTorch BN train).
        s = jnp.sum(y, axis=0, keepdims=True)              # (1, Dout)
        ss = jnp.sum(y * y, axis=0, keepdims=True)         # (1, Dout)
        mean = s * inv_n
        var = jnp.maximum(ss * inv_n - mean * mean, 0.0)   # guard tiny negatives
        # Fold BN into a single scale/shift over the (N, Dout) tile.
        a = g_ref[...] * jax.lax.rsqrt(var + eps)          # (1, Dout)
        c = beta_ref[...] - mean * a                       # (1, Dout)
        out = y * a + c
        if relu:
            out = jnp.maximum(out, 0.0)
        return out

    h = x_ref[...].astype(jnp.float32)
    h = linear_bn(h, w1_ref, g1_ref, be1_ref, relu=True)   # stays in VMEM
    h = linear_bn(h, w2_ref, g2_ref, be2_ref, relu=True)   # stays in VMEM
    out = linear_bn(h, w3_ref, g3_ref, be3_ref, relu=False)
    o_ref[...] = out.astype(o_ref.dtype)


def projection_mlp_simsiam(x, params, *, eps=1e-5):
    """x: (N, model_output_dim) float32 -> (N, output_dim) float32.

    Single fused pallas_call; whole problem resident in VMEM (small shapes)."""
    n, d_in = x.shape
    hidden = params["w1"].shape[1]
    d_out = params["w3"].shape[1]
    assert params["w1"].shape == (d_in, hidden)
    assert params["w2"].shape == (hidden, hidden)
    assert params["w3"].shape == (hidden, d_out)

    def vec2d(v):  # (D,) -> (1, D) for TPU-friendly layout / broadcast
        return v.reshape(1, v.shape[0]).astype(jnp.float32)

    operands = (
        x,
        params["w1"], vec2d(params["g1"]), vec2d(params["beta1"]),
        params["w2"], vec2d(params["g2"]), vec2d(params["beta2"]),
        params["w3"], vec2d(params["g3"]), vec2d(params["beta3"]),
    )

    full = lambda shape: pl.BlockSpec(shape, lambda: (0,) * len(shape))
    kernel = functools.partial(_fused_mlp_kernel, eps=eps)
    return pl.pallas_call(
        kernel,
        out_shape=jax.ShapeDtypeStruct((n, d_out), jnp.float32),
        in_specs=[full(op.shape) for op in operands],
        out_specs=full((n, d_out)),
    )(*operands)


def init_params(key, model_output_dim, hidden_dim, output_dim):
    ks = jax.random.split(key, 6)

    def lin(kw, kb, d_in, d_out):
        # Deterministic synthetic init (kaiming-uniform-ish scale).
        scale = 1.0 / jnp.sqrt(d_in)
        w = jax.random.uniform(kw, (d_in, d_out), jnp.float32, -scale, scale)
        b = jax.random.uniform(kb, (d_out,), jnp.float32, -scale, scale)
        return w, b

    w1, b1 = lin(ks[0], ks[1], model_output_dim, hidden_dim)
    w2, b2 = lin(ks[2], ks[3], hidden_dim, hidden_dim)
    w3, b3 = lin(ks[4], ks[5], hidden_dim, output_dim)
    ones = lambda d: jnp.ones((d,), jnp.float32)
    zeros = lambda d: jnp.zeros((d,), jnp.float32)
    return {
        "w1": w1, "b1": b1, "g1": ones(hidden_dim), "beta1": zeros(hidden_dim),
        "w2": w2, "b2": b2, "g2": ones(hidden_dim), "beta2": zeros(hidden_dim),
        "w3": w3, "b3": b3, "g3": ones(output_dim), "beta3": zeros(output_dim),
    }


def _reference(x, p, eps=1e-5):
    # Faithful to the PyTorch module (Linear bias included; BN batch stats,
    # biased variance).  The kernel drops the bias (it cancels under BN), so
    # any difference is at f32-rounding level.
    def layer(h, w, b, g, be, relu):
        y = h @ w + b
        m = y.mean(0, keepdims=True)
        v = ((y - m) ** 2).mean(0, keepdims=True)
        y = (y - m) / jnp.sqrt(v + eps) * g + be
        return jnp.maximum(y, 0.0) if relu else y

    h = layer(x, p["w1"], p["b1"], p["g1"], p["beta1"], True)
    h = layer(h, p["w2"], p["b2"], p["g2"], p["beta2"], True)
    return layer(h, p["w3"], p["b3"], p["g3"], p["beta3"], False)


if __name__ == "__main__":
    key = jax.random.PRNGKey(0)
    k_x, k_p = jax.random.split(key)

    batch = 8
    model_output_dim = 32
    hidden_dim = 128
    output_dim = 128

    x = jax.random.normal(k_x, (batch, model_output_dim), jnp.float32)
    params = init_params(k_p, model_output_dim, hidden_dim, output_dim)

    out = projection_mlp_simsiam(x, params)
    out = jax.block_until_ready(out)

    ref = _reference(x, params)
    assert out.shape == (batch, output_dim)
    assert jnp.allclose(out, ref, atol=1e-4, rtol=1e-4)

    print("KERNEL_OK")
</pallas_src>

<mosaic_0001>
module attributes {stable_mosaic.version = 11 : i64} {
  func.func @_fused_mlp_kernel(%arg0: memref<8x32xf32, #tpu.memory_space<vmem>>, %arg1: memref<32x128xf32, #tpu.memory_space<vmem>>, %arg2: memref<1x128xf32, #tpu.memory_space<vmem>>, %arg3: memref<1x128xf32, #tpu.memory_space<vmem>>, %arg4: memref<128x128xf32, #tpu.memory_space<vmem>>, %arg5: memref<1x128xf32, #tpu.memory_space<vmem>>, %arg6: memref<1x128xf32, #tpu.memory_space<vmem>>, %arg7: memref<128x128xf32, #tpu.memory_space<vmem>>, %arg8: memref<1x128xf32, #tpu.memory_space<vmem>>, %arg9: memref<1x128xf32, #tpu.memory_space<vmem>>, %arg10: memref<8x128xf32, #tpu.memory_space<vmem>>) attributes {dimension_semantics = [], scalar_prefetch = 0 : i64, scratch_operands = 0 : i64, tpu.core_type = #tpu.core_type<tc>} {
    %c0 = arith.constant 0 : index
    %c0_0 = arith.constant 0 : index
    %0 = vector.load %arg0[%c0, %c0_0] : memref<8x32xf32, #tpu.memory_space<vmem>>, vector<8x32xf32>
    %c0_1 = arith.constant 0 : index
    %c0_2 = arith.constant 0 : index
    %1 = vector.load %arg1[%c0_1, %c0_2] : memref<32x128xf32, #tpu.memory_space<vmem>>, vector<32x128xf32>
    %cst = arith.constant dense<0.000000e+00> : vector<8x128xf32>
    %2 = tpu.matmul %0, %1, %cst {dimension_numbers = #tpu.dot_dimension_numbers<[1], [0], [0], [1], [0, 0, 1, 1], [], []>} : vector<8x32xf32>, vector<32x128xf32>, vector<8x128xf32> -> vector<8x128xf32>
    %cst_3 = arith.constant dense<0.000000e+00> : vector<128xf32>
    %3 = vector.multi_reduction <add>, %2, %cst_3 [0] : vector<8x128xf32> to vector<128xf32>
    %4 = vector.shape_cast %3 : vector<128xf32> to vector<1x128xf32>
    %5 = arith.mulf %2, %2 : vector<8x128xf32>
    %cst_4 = arith.constant dense<0.000000e+00> : vector<128xf32>
    %6 = vector.multi_reduction <add>, %5, %cst_4 [0] : vector<8x128xf32> to vector<128xf32>
    %7 = vector.shape_cast %6 : vector<128xf32> to vector<1x128xf32>
    %cst_5 = arith.constant 1.250000e-01 : f32
    %8 = vector.broadcast %cst_5 : f32 to vector<1x128xf32>
    %9 = arith.mulf %4, %8 : vector<1x128xf32>
    %cst_6 = arith.constant 1.250000e-01 : f32
    %10 = vector.broadcast %cst_6 : f32 to vector<1x128xf32>
    %11 = arith.mulf %7, %10 : vector<1x128xf32>
    %12 = arith.mulf %9, %9 : vector<1x128xf32>
    %13 = arith.subf %11, %12 : vector<1x128xf32>
    %cst_7 = arith.constant 0.000000e+00 : f32
    %14 = vector.broadcast %cst_7 : f32 to vector<1x128xf32>
    %15 = arith.maximumf %13, %14 : vector<1x128xf32>
    %c0_8 = arith.constant 0 : index
    %c0_9 = arith.constant 0 : index
    %16 = vector.load %arg2[%c0_8, %c0_9] : memref<1x128xf32, #tpu.memory_space<vmem>>, vector<1x128xf32>
    %cst_10 = arith.constant 9.99999974E-6 : f32
    %17 = vector.broadcast %cst_10 : f32 to vector<1x128xf32>
    %18 = arith.addf %15, %17 : vector<1x128xf32>
    %19 = math.rsqrt %18 : vector<1x128xf32>
    %20 = arith.mulf %16, %19 : vector<1x128xf32>
    %c0_11 = arith.constant 0 : index
    %c0_12 = arith.constant 0 : index
    %21 = vector.load %arg3[%c0_11, %c0_12] : memref<1x128xf32, #tpu.memory_space<vmem>>, vector<1x128xf32>
    %22 = arith.mulf %9, %20 : vector<1x128xf32>
    %23 = arith.subf %21, %22 : vector<1x128xf32>
    %24 = vector.broadcast %20 : vector<1x128xf32> to vector<8x128xf32>
    %25 = arith.mulf %2, %24 : vector<8x128xf32>
    %26 = vector.broadcast %23 : vector<1x128xf32> to vector<8x128xf32>
    %27 = arith.addf %25, %26 : vector<8x128xf32>
    %cst_13 = arith.constant 0.000000e+00 : f32
    %28 = vector.broadcast %cst_13 : f32 to vector<8x128xf32>
    %29 = arith.maximumf %27, %28 : vector<8x128xf32>
    %c0_14 = arith.constant 0 : index
    %c0_15 = arith.constant 0 : index
    %30 = vector.load %arg4[%c0_14, %c0_15] : memref<128x128xf32, #tpu.memory_space<vmem>>, vector<128x128xf32>
    %cst_16 = arith.constant dense<0.000000e+00> : vector<8x128xf32>
    %31 = tpu.matmul %29, %30, %cst_16 {dimension_numbers = #tpu.dot_dimension_numbers<[1], [0], [0], [1], [0, 0, 1, 1], [], []>} : vector<8x128xf32>, vector<128x128xf32>, vector<8x128xf32> -> vector<8x128xf32>
    %cst_17 = arith.constant dense<0.000000e+00> : vector<128xf32>
    %32 = vector.multi_reduction <add>, %31, %cst_17 [0] : vector<8x128xf32> to vector<128xf32>
    %33 = vector.shape_cast %32 : vector<128xf32> to vector<1x128xf32>
    %34 = arith.mulf %31, %31 : vector<8x128xf32>
    %cst_18 = arith.constant dense<0.000000e+00> : vector<128xf32>
    %35 = vector.multi_reduction <add>, %34, %cst_18 [0] : vector<8x128xf32> to vector<128xf32>
    %36 = vector.shape_cast %35 : vector<128xf32> to vector<1x128xf32>
    %cst_19 = arith.constant 1.250000e-01 : f32
    %37 = vector.broadcast %cst_19 : f32 to vector<1x128xf32>
    %38 = arith.mulf %33, %37 : vector<1x128xf32>
    %cst_20 = arith.constant 1.250000e-01 : f32
    %39 = vector.broadcast %cst_20 : f32 to vector<1x128xf32>
    %40 = arith.mulf %36, %39 : vector<1x128xf32>
    %41 = arith.mulf %38, %38 : vector<1x128xf32>
    %42 = arith.subf %40, %41 : vector<1x128xf32>
    %cst_21 = arith.constant 0.000000e+00 : f32
    %43 = vector.broadcast %cst_21 : f32 to vector<1x128xf32>
    %44 = arith.maximumf %42, %43 : vector<1x128xf32>
    %c0_22 = arith.constant 0 : index
    %c0_23 = arith.constant 0 : index
    %45 = vector.load %arg5[%c0_22, %c0_23] : memref<1x128xf32, #tpu.memory_space<vmem>>, vector<1x128xf32>
    %cst_24 = arith.constant 9.99999974E-6 : f32
    %46 = vector.broadcast %cst_24 : f32 to vector<1x128xf32>
    %47 = arith.addf %44, %46 : vector<1x128xf32>
    %48 = math.rsqrt %47 : vector<1x128xf32>
    %49 = arith.mulf %45, %48 : vector<1x128xf32>
    %c0_25 = arith.constant 0 : index
    %c0_26 = arith.constant 0 : index
    %50 = vector.load %arg6[%c0_25, %c0_26] : memref<1x128xf32, #tpu.memory_space<vmem>>, vector<1x128xf32>
    %51 = arith.mulf %38, %49 : vector<1x128xf32>
    %52 = arith.subf %50, %51 : vector<1x128xf32>
    %53 = vector.broadcast %49 : vector<1x128xf32> to vector<8x128xf32>
    %54 = arith.mulf %31, %53 : vector<8x128xf32>
    %55 = vector.broadcast %52 : vector<1x128xf32> to vector<8x128xf32>
    %56 = arith.addf %54, %55 : vector<8x128xf32>
    %cst_27 = arith.constant 0.000000e+00 : f32
    %57 = vector.broadcast %cst_27 : f32 to vector<8x128xf32>
    %58 = arith.maximumf %56, %57 : vector<8x128xf32>
    %c0_28 = arith.constant 0 : index
    %c0_29 = arith.constant 0 : index
    %59 = vector.load %arg7[%c0_28, %c0_29] : memref<128x128xf32, #tpu.memory_space<vmem>>, vector<128x128xf32>
    %cst_30 = arith.constant dense<0.000000e+00> : vector<8x128xf32>
    %60 = tpu.matmul %58, %59, %cst_30 {dimension_numbers = #tpu.dot_dimension_numbers<[1], [0], [0], [1], [0, 0, 1, 1], [], []>} : vector<8x128xf32>, vector<128x128xf32>, vector<8x128xf32> -> vector<8x128xf32>
    %cst_31 = arith.constant dense<0.000000e+00> : vector<128xf32>
    %61 = vector.multi_reduction <add>, %60, %cst_31 [0] : vector<8x128xf32> to vector<128xf32>
    %62 = vector.shape_cast %61 : vector<128xf32> to vector<1x128xf32>
    %63 = arith.mulf %60, %60 : vector<8x128xf32>
    %cst_32 = arith.constant dense<0.000000e+00> : vector<128xf32>
    %64 = vector.multi_reduction <add>, %63, %cst_32 [0] : vector<8x128xf32> to vector<128xf32>
    %65 = vector.shape_cast %64 : vector<128xf32> to vector<1x128xf32>
    %cst_33 = arith.constant 1.250000e-01 : f32
    %66 = vector.broadcast %cst_33 : f32 to vector<1x128xf32>
    %67 = arith.mulf %62, %66 : vector<1x128xf32>
    %cst_34 = arith.constant 1.250000e-01 : f32
    %68 = vector.broadcast %cst_34 : f32 to vector<1x128xf32>
    %69 = arith.mulf %65, %68 : vector<1x128xf32>
    %70 = arith.mulf %67, %67 : vector<1x128xf32>
    %71 = arith.subf %69, %70 : vector<1x128xf32>
    %cst_35 = arith.constant 0.000000e+00 : f32
    %72 = vector.broadcast %cst_35 : f32 to vector<1x128xf32>
    %73 = arith.maximumf %71, %72 : vector<1x128xf32>
    %c0_36 = arith.constant 0 : index
    %c0_37 = arith.constant 0 : index
    %74 = vector.load %arg8[%c0_36, %c0_37] : memref<1x128xf32, #tpu.memory_space<vmem>>, vector<1x128xf32>
    %cst_38 = arith.constant 9.99999974E-6 : f32
    %75 = vector.broadcast %cst_38 : f32 to vector<1x128xf32>
    %76 = arith.addf %73, %75 : vector<1x128xf32>
    %77 = math.rsqrt %76 : vector<1x128xf32>
    %78 = arith.mulf %74, %77 : vector<1x128xf32>
    %c0_39 = arith.constant 0 : index
    %c0_40 = arith.constant 0 : index
    %79 = vector.load %arg9[%c0_39, %c0_40] : memref<1x128xf32, #tpu.memory_space<vmem>>, vector<1x128xf32>
    %80 = arith.mulf %67, %78 : vector<1x128xf32>
    %81 = arith.subf %79, %80 : vector<1x128xf32>
    %82 = vector.broadcast %78 : vector<1x128xf32> to vector<8x128xf32>
    %83 = arith.mulf %60, %82 : vector<8x128xf32>
    %84 = vector.broadcast %81 : vector<1x128xf32> to vector<8x128xf32>
    %85 = arith.addf %83, %84 : vector<8x128xf32>
    %c0_41 = arith.constant 0 : index
    %c0_42 = arith.constant 0 : index
    %86 = vector.load %arg10[%c0_41, %c0_42] : memref<8x128xf32, #tpu.memory_space<vmem>>, vector<8x128xf32>
    tpu.vector_store %arg10[%c0_41, %c0_42], %85 {strides = array<i32>} : memref<8x128xf32, #tpu.memory_space<vmem>>, vector<8x128xf32>,
    return
  }
}

</mosaic_0001>

<bundles_post_ra>
// kernel: tpu_custom_call.1
= control target key start
LH: loop header
LB: loop body
LE: loop exit
PB: predicated region body
PF: predicated region fallthrough
CT: control target
= control target key end

     0   :  { %15 = vsyncpa [#allocation3], 0  ;;  %s967_s0 = inlined_call_operand.hbm [shape: f32[8,32], index: 0, kind: input, shape index: {}]   ;;  %s968_s1 = inlined_call_operand.hbm [shape: f32[32,128], index: 1, kind: input, shape index: {}]   ;;  %s969_s2 = inlined_call_operand.vmem [shape: f32[1,128], index: 2, kind: input, shape index: {}]   ;;  %s970_s3 = inlined_call_operand.vmem [shape: f32[1,128], index: 3, kind: input, shape index: {}]   ;;  %s971_s4 = inlined_call_operand.hbm [shape: f32[128,128], index: 4, kind: input, shape index: {}]   ;;  %s972_s5 = inlined_call_operand.vmem [shape: f32[1,128], index: 5, kind: input, shape index: {}]   ;;  %s973_s6 = inlined_call_operand.vmem [shape: f32[1,128], index: 6, kind: input, shape index: {}]   ;;  %s974_s7 = inlined_call_operand.hbm [shape: f32[128,128], index: 7, kind: input, shape index: {}]   ;;  %s975_s8 = inlined_call_operand.vmem [shape: f32[1,128], index: 8, kind: input, shape index: {}]   ;;  %s976_s9 = inlined_call_operand.vmem [shape: f32[1,128], index: 9, kind: input, shape index: {}]   ;;  %s977_s10 = inlined_call_operand.hbm [shape: f32[8,128], index: 10, kind: output, shape index: {}]  }
   0x1   :  { %16 = vsyncpa [#allocation6], 0 }
   0x2   :  { %17 = vsyncpa [#allocation9], 0 }
   0x3   :  { %18 = vsyncpa [#allocation4], 0  ;;  %s786_s13 = smov [#allocation5]   ;;  %s668_s17 = scalar_lea.hbm %s968_s1, 512 }
   0x4   :  { %s34_s14 = sshll.u32 %s786_s13, 4  ;;  %p669_p0 = scmp.ne.s32.totalorder %s968_s1, %s668_s17  ;;  %s35_s14 = int_to_ptr.vmem [resolvable:$true] %s34_s14 }
   0x5   :  { %p672_p1 = scmp.lt.u32.totalorder %s668_s17, %s968_s1 }
   0x7   :  { %p674_p2 = pnand %p672_p1, %p669_p0 }
   0x9   :  { %677 = shalt.err (!%p674_p2)
}
   0xa   :  { %s678_s22 = scalar_lea.vmem %s35_s14, 512  ;;  %p683_p4 = scmp.lt.s32.totalorder %s35_s14, %s35_s14 }
   0xb   :  { %p679_p3 = scmp.ne.s32.totalorder %s35_s14, %s678_s22  ;;  %p684_p5 = scmp.lt.s32.totalorder %s678_s22, %s678_s22 }
   0xd   :  { %p685_p6 = por %p684_p5, %p683_p4 }
   0xf   :  { %p686_p7 = pnand %p685_p6, %p679_p3 }
  0x11   :  { %689 = shalt.err (!%p686_p7)
}
  0x12   :  { %s787_s23 = smov 128   ;;  %s788_s24 = smov 8  }
  0x13   :  { %40 = dma.hbm_to_vmem [thread:$0]  %s968_s1, 512, %s35_s14, [#allocation6], %s787_s23, %s787_s23, %s788_s24  }
  0x14   :  { %s789_s27 = smov [#allocation2]   ;;  %s790_s29 = smov [#allocation7]  }
  0x15   :  { %s25_s28 = sshll.u32 %s789_s27, 4  ;;  %s50_s30 = sshll.u32 %s790_s29, 4  ;;  %s26_s28 = int_to_ptr.vmem [resolvable:$true] %s25_s28  ;;  %s51_s30 = int_to_ptr.vmem [resolvable:$true] %s50_s30 }
  0x16   :  { %s690_s13 = scalar_lea.hbm %s967_s0, 128 }
  0x17   :  { %p691_p8 = scmp.ne.s32.totalorder %s967_s0, %s690_s13  ;;  %p694_p9 = scmp.lt.u32.totalorder %s690_s13, %s967_s0 }
  0x19   :  { %p696_p10 = pnand %p694_p9, %p691_p8 }
  0x1b   :  { %699 = shalt.err (!%p696_p10)
}
  0x1c   :  { %s700_s1 = scalar_lea.vmem %s26_s28, 128  ;;  %p705_p12 = scmp.lt.s32.totalorder %s26_s28, %s26_s28 }
  0x1d   :  { %p701_p11 = scmp.ne.s32.totalorder %s26_s28, %s700_s1  ;;  %p706_p13 = scmp.lt.s32.totalorder %s700_s1, %s700_s1 }
  0x1f   :  { %p707_p0 = por %p706_p13, %p705_p12 }
  0x21   :  { %p708_p1 = pnand %p707_p0, %p701_p11 }
  0x23   :  { %711 = shalt.err (!%p708_p1)
}
  0x24   :  { %28 = dma.hbm_to_vmem [thread:$0]  %s967_s0, 128, %s26_s28, [#allocation3]  }
  0x25   :  { %s712_s22 = scalar_lea.hbm %s971_s4, 2048 }
  0x26   :  { %p713_p2 = scmp.ne.s32.totalorder %s971_s4, %s712_s22  ;;  %p716_p3 = scmp.lt.u32.totalorder %s712_s22, %s971_s4 }
  0x28   :  { %p718_p4 = pnand %p716_p3, %p713_p2 }
  0x2a   :  { %721 = shalt.err (!%p718_p4)
}
  0x2b   :  { %s722_s11 = scalar_lea.vmem %s51_s30, 2048  ;;  %p727_p6 = scmp.lt.s32.totalorder %s51_s30, %s51_s30 }
  0x2c   :  { %p723_p5 = scmp.ne.s32.totalorder %s51_s30, %s722_s11  ;;  %p728_p7 = scmp.lt.s32.totalorder %s722_s11, %s722_s11 }
  0x2e   :  { %p729_p8 = por %p728_p7, %p727_p6 }
  0x30   :  { %p730_p9 = pnand %p729_p8, %p723_p5 }
  0x32   :  { %733 = shalt.err (!%p730_p9)
}
  0x33   :  { %56 = dma.hbm_to_vmem [thread:$0]  %s971_s4, 2048, %s51_s30, [#allocation6], %s787_s23, %s787_s23, %s788_s24  }
  0x34   :  { %s791_s12 = smov [#allocation8]   ;;  %s734_s17 = scalar_lea.hbm %s974_s7, 2048 }
  0x35   :  { %s66_s13 = sshll.u32 %s791_s12, 4  ;;  %p735_p10 = scmp.ne.s32.totalorder %s974_s7, %s734_s17  ;;  %s67_s13 = int_to_ptr.vmem [resolvable:$true] %s66_s13 }
  0x36   :  { %p738_p11 = scmp.lt.u32.totalorder %s734_s17, %s974_s7 }
  0x38   :  { %p740_p12 = pnand %p738_p11, %p735_p10 }
  0x3a   :  { %743 = shalt.err (!%p740_p12)
}
  0x3b   :  { %s744_s20 = scalar_lea.vmem %s67_s13, 2048  ;;  %p749_p0 = scmp.lt.s32.totalorder %s67_s13, %s67_s13 }
  0x3c   :  { %p745_p13 = scmp.ne.s32.totalorder %s67_s13, %s744_s20  ;;  %p750_p1 = scmp.lt.s32.totalorder %s744_s20, %s744_s20 }
  0x3e   :  { %p751_p2 = por %p750_p1, %p749_p0 }
  0x40   :  { %p752_p3 = pnand %p751_p2, %p745_p13 }
  0x42   :  { %755 = shalt.err (!%p752_p3)
}
  0x43   :  { %72 = dma.hbm_to_vmem [thread:$0]  %s974_s7, 2048, %s67_s13, [#allocation9], %s787_s23, %s787_s23, %s788_s24  }
  0x44   :  { %778 = dma.done.wait [#allocation3], 128  }
  0x45   :  { %779 = vsyncadd [#allocation3], 4294967168 }
  0x46   :  { %780 = dma.done.wait [#allocation6], 2560  }
  0x47   :  { %781 = vsyncadd [#allocation6], 4294964736 }
  0x48   :  { %782 = dma.done.wait [#allocation9], 2048  }
  0x49   :  { %783 = vsyncadd [#allocation9], 4294965248  ;;  %v792_v0 = vmov 0.0|0.0   ;;  %vm793_vm0 = vmmov 0   ;;  %v794_v1 = vmov 0.0   ;;  %v90_v2 = vld [vmem:[#allocation5] sm:$0xff]  ;;  %v194_v54 = vlaneseq }
  0x4a   :  { %598 = vmatprep.subr.bf16.mxu0 %v792_v0  ;;  %525 = vmatprep.mubr.msk.f32.mxu0 %vm793_vm0, %v794_v1  ;;  %v91_v3 = vld [vmem:[#allocation5 + $0x8] sm:$0xff]  ;;  %v92_v4 = vld [vmem:[#allocation5 + $0x10] sm:$0xff]  ;;  %v93_v6 = vld [vmem:[#allocation5 + $0x18] sm:$0xff]  ;;  %vm94_vm1 = vcmask 261120   ;;  %s795_s29 = smov [#allocation10]  }
  0x4b   :  { %604 = vmatprep.subr.bf16.mxu1 %v792_v0  ;;  %560 = vmatprep.mubr.msk.f32.mxu1 %vm793_vm0, %v794_v1  ;;  %v599_v5 = vpack.c.bf16 %v91_v3, %v90_v2  ;;  %v602_v7 = vpack.c.bf16 %v93_v6, %v92_v4  ;;  %v89_v8 = vld [vmem:[#allocation2] sm:$0xff]  ;;  %v208_v9 = vld [vmem:[#allocation7] sm:$0xff]  ;;  %v209_v10 = vld [vmem:[#allocation7 + $0x8] sm:$0xff]  ;;  %v195_v55 = vshrl.u32 %v194_v54, 7  ;;  %s466_s11 = sshll.u32 %s795_s29, 4  ;;  %s467_s11 = int_to_ptr.vmem [resolvable:$true] %s466_s11 }
  0x4c   :  { %v605_v11 = vpack.c.bf16 %v209_v10, %v208_v9  ;;  %v210_v12 = vld [vmem:[#allocation7 + $0x10] sm:$0xff]  ;;  %v211_v13 = vld [vmem:[#allocation7 + $0x18] sm:$0xff]  ;;  %v212_v15 = vld [vmem:[#allocation7 + $0x20] sm:$0xff]  ;;  %s756_s0 = scalar_lea.vmem %s467_s11, 128  ;;  %p761_p5 = scmp.lt.s32.totalorder %s467_s11, %s467_s11 }
  0x4d   :  { %600 = vmatpush3.bf16.msra.mxu0 %v599_v5  ;;  %v608_v14 = vpack.c.bf16 %v211_v13, %v210_v12  ;;  %v213_v16 = vld [vmem:[#allocation7 + $0x28] sm:$0xff]  ;;  %v214_v18 = vld [vmem:[#allocation7 + $0x30] sm:$0xff]  ;;  %v215_v19 = vld [vmem:[#allocation7 + $0x38] sm:$0xff]  ;;  %v925_v57 = vsub.s32 0, %v195_v55  ;;  %p757_p4 = scmp.ne.s32.totalorder %s467_s11, %s756_s0  ;;  %p762_p6 = scmp.lt.s32.totalorder %s756_s0, %s756_s0 }
  0x4e   :  { %601 = vmatprep.subr.bf16.mxu0 %v792_v0  ;;  %606 = vmatpush3.bf16.msra.mxu1 %v605_v11  ;;  %v611_v17 = vpack.c.bf16 %v213_v16, %v212_v15  ;;  %v614_v20 = vpack.c.bf16 %v215_v19, %v214_v18  ;;  %v216_v21 = vld [vmem:[#allocation7 + $0x40] sm:$0xff]  ;;  %v217_v22 = vld [vmem:[#allocation7 + $0x48] sm:$0xff]  ;;  %v218_v24 = vld [vmem:[#allocation7 + $0x50] sm:$0xff] }
  0x4f   :  { %607 = vmatprep.subr.bf16.mxu1 %v792_v0  ;;  %v617_v23 = vpack.c.bf16 %v217_v22, %v216_v21  ;;  %v219_v25 = vld [vmem:[#allocation7 + $0x58] sm:$0xff]  ;;  %v220_v27 = vld [vmem:[#allocation7 + $0x60] sm:$0xff]  ;;  %v221_v28 = vld [vmem:[#allocation7 + $0x68] sm:$0xff]  ;;  %p763_p7 = por %p762_p6, %p761_p5 }
  0x50   :  { %v620_v26 = vpack.c.bf16 %v219_v25, %v218_v24  ;;  %v623_v29 = vpack.c.bf16 %v221_v28, %v220_v27  ;;  %v222_v30 = vld [vmem:[#allocation7 + $0x70] sm:$0xff]  ;;  %v223_v31 = vld [vmem:[#allocation7 + $0x78] sm:$0xff]  ;;  %v334_v5 = vld [vmem:[#allocation8] sm:$0xff] }
  0x51   :  { %603 = vmatpush3.bf16.msra.mxu0 %v602_v7  ;;  %v626_v32 = vpack.c.bf16 %v223_v31, %v222_v30  ;;  %v186_v56 = vld [vmem:[%s969_s2] sm:$0x1]  ;;  %v335_v6 = vld [vmem:[#allocation8 + $0x8] sm:$0xff]  ;;  %v338_v11 = vld [vmem:[#allocation8 + $0x20] sm:$0xff]  ;;  %p764_p8 = pnand %p763_p7, %p757_p4 }
  0x52   :  { %628 = vmatprep.subr.bf16.mxu0 %v792_v0  ;;  %609 = vmatpush3.bf16.msra.mxu1 %v608_v14  ;;  %v190_v60 = vld [vmem:[%s970_s3] sm:$0x1]  ;;  %v629_v7 = vpack.c.bf16 %v335_v6, %v334_v5  ;;  %v339_v12 = vld [vmem:[#allocation8 + $0x28] sm:$0xff]  ;;  %v340_v14 = vld [vmem:[#allocation8 + $0x30] sm:$0xff] }
  0x53   :  { %610 = vmatprep.subr.bf16.mxu1 %v792_v0  ;;  %v337_v9 = vld [vmem:[#allocation8 + $0x18] sm:$0xff]  ;;  %v635_v13 = vpack.c.bf16 %v339_v12, %v338_v11  ;;  %v343_v18 = vld [vmem:[#allocation8 + $0x48] sm:$0xff] }
  0x54   :  { %526 = vmatmul.mubr.msk.f32.vlgmr.msra.gmra.mrb[0].mxu0 %vm94_vm1, %v89_v8  ;;  %v336_v8 = vld [vmem:[#allocation8 + $0x10] sm:$0xff]  ;;  %v341_v15 = vld [vmem:[#allocation8 + $0x38] sm:$0xff]  ;;  %v347_v24 = vld [vmem:[#allocation8 + $0x68] sm:$0xff] }
  0x55   :  { %595 = vmatprep.mubr.msk.f32.mxu0 %vm793_vm0, %v794_v1  ;;  %630 = vmatpush3.bf16.msra.mxu0 %v629_v7  ;;  %v632_v10 = vpack.c.bf16 %v337_v9, %v336_v8  ;;  %v638_v16 = vpack.c.bf16 %v341_v15, %v340_v14  ;;  %v345_v21 = vld [vmem:[#allocation8 + $0x58] sm:$0xff] }
  0x56   :  { %612 = vmatpush3.bf16.msra.mxu1 %v611_v17  ;;  %631 = vmatprep.subr.bf16.mxu0 %v792_v0  ;;  %v342_v17 = vld [vmem:[#allocation8 + $0x40] sm:$0xff]  ;;  %v349_v27 = vld [vmem:[#allocation8 + $0x78] sm:$0xff] }
  0x57   :  { %613 = vmatprep.subr.bf16.mxu1 %v792_v0  ;;  %v641_v19 = vpack.c.bf16 %v343_v18, %v342_v17 }
  0x59   :  { %633 = vmatpush3.bf16.msra.mxu0 %v632_v10 }
  0x5a   :  { %615 = vmatpush3.bf16.msra.mxu1 %v614_v20  ;;  %634 = vmatprep.subr.bf16.mxu0 %v792_v0  ;;  %v344_v20 = vld [vmem:[#allocation8 + $0x50] sm:$0xff] }
  0x5b   :  { %616 = vmatprep.subr.bf16.mxu1 %v792_v0  ;;  %v644_v22 = vpack.c.bf16 %v345_v21, %v344_v20 }
  0x5d   :  { %636 = vmatpush3.bf16.msra.mxu0 %v635_v13 }
  0x5e   :  { %618 = vmatpush3.bf16.msra.mxu1 %v617_v23  ;;  %637 = vmatprep.subr.bf16.mxu0 %v792_v0  ;;  %v346_v23 = vld [vmem:[#allocation8 + $0x60] sm:$0xff] }
  0x5f   :  { %619 = vmatprep.subr.bf16.mxu1 %v792_v0  ;;  %v647_v25 = vpack.c.bf16 %v347_v24, %v346_v23 }
  0x61   :  { %639 = vmatpush3.bf16.msra.mxu0 %v638_v16 }
  0x62   :  { %621 = vmatpush3.bf16.msra.mxu1 %v620_v26  ;;  %640 = vmatprep.subr.bf16.mxu0 %v792_v0  ;;  %v348_v26 = vld [vmem:[#allocation8 + $0x70] sm:$0xff] }
  0x63   :  { %622 = vmatprep.subr.bf16.mxu1 %v792_v0  ;;  %v650_v28 = vpack.c.bf16 %v349_v27, %v348_v26 }
  0x65   :  { %642 = vmatpush3.bf16.msra.mxu0 %v641_v19  ;;  %v438_v19 = vld [vmem:[%s975_s8] sm:$0x1] }
  0x66   :  { %624 = vmatpush3.bf16.msra.mxu1 %v623_v29  ;;  %643 = vmatprep.subr.bf16.mxu0 %v792_v0 }
  0x67   :  { %625 = vmatprep.subr.bf16.mxu1 %v792_v0 }
  0x69   :  { %645 = vmatpush3.bf16.msra.mxu0 %v644_v22  ;;  %v442_v22 = vld [vmem:[%s976_s9] sm:$0x1] }
  0x6a   :  { %627 = vmatpush3.bf16.msra.mxu1 %v626_v32  ;;  %646 = vmatprep.subr.bf16.mxu0 %v792_v0 }
  0x6d   :  { %648 = vmatpush3.bf16.msra.mxu0 %v647_v25 }
  0x6e   :  { %649 = vmatprep.subr.bf16.mxu0 %v792_v0 }
  0x71   :  { %651 = vmatpush3.bf16.msra.mxu0 %v650_v28 }
 0x127   :  { %v164_v33 = vpop.f32.mrb[0].mxu0 }
 0x128   :  { %v168_v34 = vrot.slane %v164_v33, 4  ;;  %v174_v35 = vmul.f32 %v164_v33, %v164_v33  ;;  %v527_v36 = vpop.f32.mrb[1].mxu0 }
 0x12a   :  { %v169_v37 = vadd.f32 %v168_v34, %v164_v33  ;;  %v175_v38 = vrot.slane %v174_v35, 4 }
 0x12c   :  { %v170_v39 = vrot.slane %v169_v37, 2  ;;  %v176_v40 = vadd.f32 %v175_v38, %v174_v35 }
 0x12e   :  { %v171_v41 = vadd.f32 %v170_v39, %v169_v37  ;;  %v177_v42 = vrot.slane %v176_v40, 2 }
 0x130   :  { %v172_v43 = vrot.slane %v171_v41, 1  ;;  %v178_v44 = vadd.f32 %v177_v42, %v176_v40 }
 0x132   :  { %v173_v45 = vadd.f32 %v172_v43, %v171_v41  ;;  %v179_v46 = vrot.slane %v178_v44, 1 }
 0x134   :  { %v180_v47 = vadd.f32 %v179_v46, %v178_v44  ;;  %v181_v48 = vmul.f32 0.125, %v173_v45 }
 0x136   :  { %v182_v49 = vmul.f32 0.125, %v180_v47  ;;  %v183_v50 = vmul.f32 %v181_v48, %v181_v48 }
 0x138   :  { %v184_v51 = vsub.f32 %v182_v49, %v183_v50  ;;  %v312_v49 = vld [vmem:[%s972_s5] sm:$0x1] }
 0x13a   :  { %v185_v52 = vmax.f32 %v184_v51, 0.0 }
 0x13c   :  { %v187_v53 = vadd.f32 1e-05, %v185_v52  ;;  %v316_v52 = vld [vmem:[%s973_s6] sm:$0x1] }
 0x13e   :  { %662 = vrsqrt.f32 %v187_v53 }
 0x148   :  { %v663_v58 = vpop.eup %662 }
 0x149   :  { %v189_v59 = vmul.f32 %v663_v58, %v186_v56 }
 0x14b   :  { %v197_v61 = vrot.slane %v189_v59, %v925_v57  ;;  %v191_v62 = vmul.f32 %v189_v59, %v181_v48 }
 0x14d   :  { %v192_v63 = vsub.f32 %v190_v60, %v191_v62  ;;  %v199_v1 = vmul.f32 %v197_v61, %v164_v33 }
 0x14f   :  { %v204_v2 = vrot.slane %v192_v63, %v925_v57 }
 0x151   :  { %v206_v3 = vadd.f32 %v204_v2, %v199_v1 }
 0x153   :  { %v207_v4 = vmax.f32 %v206_v3, 0.0 }
 0x155   :  { %561 = vmatmul.mubr.f32.vlgmr.msra.gmra.mrb[0].mxu1 %v207_v4 }
 0x228   :  { %v290_v29 = vpop.f32.mrb[0].mxu1 }
 0x229   :  { %v294_v30 = vrot.slane %v290_v29, 4  ;;  %v300_v31 = vmul.f32 %v290_v29, %v290_v29  ;;  %v562_v32 = vpop.f32.mrb[1].mxu1 }
 0x22b   :  { %v295_v33 = vadd.f32 %v294_v30, %v290_v29  ;;  %v301_v34 = vrot.slane %v300_v31, 4 }
 0x22d   :  { %v296_v35 = vrot.slane %v295_v33, 2  ;;  %v302_v36 = vadd.f32 %v301_v34, %v300_v31 }
 0x22f   :  { %v297_v37 = vadd.f32 %v296_v35, %v295_v33  ;;  %v303_v38 = vrot.slane %v302_v36, 2 }
 0x231   :  { %v298_v39 = vrot.slane %v297_v37, 1  ;;  %v304_v40 = vadd.f32 %v303_v38, %v302_v36 }
 0x233   :  { %v299_v41 = vadd.f32 %v298_v39, %v297_v37  ;;  %v305_v42 = vrot.slane %v304_v40, 1 }
 0x235   :  { %v306_v43 = vadd.f32 %v305_v42, %v304_v40  ;;  %v307_v0 = vmul.f32 0.125, %v299_v41 }
 0x237   :  { %v308_v44 = vmul.f32 0.125, %v306_v43  ;;  %v309_v45 = vmul.f32 %v307_v0, %v307_v0 }
 0x239   :  { %v310_v46 = vsub.f32 %v308_v44, %v309_v45 }
 0x23b   :  { %v311_v47 = vmax.f32 %v310_v46, 0.0 }
 0x23d   :  { %v313_v48 = vadd.f32 1e-05, %v311_v47 }
 0x23f   :  { %664 = vrsqrt.f32 %v313_v48 }
 0x249   :  { %v665_v50 = vpop.eup %664 }
 0x24a   :  { %v315_v51 = vmul.f32 %v665_v50, %v312_v49 }
 0x24c   :  { %v317_v53 = vmul.f32 %v315_v51, %v307_v0  ;;  %v323_v54 = vrot.slane %v315_v51, %v925_v57 }
 0x24e   :  { %v318_v55 = vsub.f32 %v316_v52, %v317_v53  ;;  %v325_v56 = vmul.f32 %v323_v54, %v290_v29 }
 0x250   :  { %v330_v58 = vrot.slane %v318_v55, %v925_v57 }
 0x252   :  { %v332_v59 = vadd.f32 %v330_v58, %v325_v56 }
 0x254   :  { %v333_v60 = vmax.f32 %v332_v59, 0.0 }
 0x256   :  { %596 = vmatmul.mubr.f32.vlgmr.msra.gmra.mrb[2].mxu0 %v333_v60 }
 0x329   :  { %v416_v61 = vpop.f32.mrb[2].mxu0 }
 0x32a   :  { %v420_v62 = vrot.slane %v416_v61, 4  ;;  %v426_v63 = vmul.f32 %v416_v61, %v416_v61  ;;  %v597_v1 = vpop.f32.mrb[3].mxu0 }
 0x32c   :  { %v421_v2 = vadd.f32 %v420_v62, %v416_v61  ;;  %v427_v3 = vrot.slane %v426_v63, 4 }
 0x32e   :  { %v422_v4 = vrot.slane %v421_v2, 2  ;;  %v428_v5 = vadd.f32 %v427_v3, %v426_v63 }
 0x330   :  { %v423_v6 = vadd.f32 %v422_v4, %v421_v2  ;;  %v429_v7 = vrot.slane %v428_v5, 2 }
 0x332   :  { %v424_v8 = vrot.slane %v423_v6, 1  ;;  %v430_v9 = vadd.f32 %v429_v7, %v428_v5 }
 0x334   :  { %v425_v10 = vadd.f32 %v424_v8, %v423_v6  ;;  %v431_v11 = vrot.slane %v430_v9, 1 }
 0x336   :  { %v432_v12 = vadd.f32 %v431_v11, %v430_v9  ;;  %v433_v13 = vmul.f32 0.125, %v425_v10 }
 0x338   :  { %v434_v14 = vmul.f32 0.125, %v432_v12  ;;  %v435_v15 = vmul.f32 %v433_v13, %v433_v13 }
 0x33a   :  { %v436_v16 = vsub.f32 %v434_v14, %v435_v15 }
 0x33c   :  { %v437_v17 = vmax.f32 %v436_v16, 0.0 }
 0x33e   :  { %v439_v18 = vadd.f32 1e-05, %v437_v17 }
 0x340   :  { %666 = vrsqrt.f32 %v439_v18 }
 0x34a   :  { %v667_v20 = vpop.eup %666 }
 0x34b   :  { %v441_v21 = vmul.f32 %v667_v20, %v438_v19 }
 0x34d   :  { %v443_v23 = vmul.f32 %v441_v21, %v433_v13  ;;  %v449_v24 = vrot.slane %v441_v21, %v925_v57 }
 0x34f   :  { %v444_v25 = vsub.f32 %v442_v22, %v443_v23  ;;  %v451_v26 = vmul.f32 %v449_v24, %v416_v61 }
 0x351   :  { %v456_v27 = vrot.slane %v444_v25, %v925_v57 }
 0x353   :  { %v458_v28 = vadd.f32 %v456_v27, %v451_v26 }
 0x355   :  { %459 = vst [vmem:[#allocation10] sm:$0xff] %v458_v28 }
 0x356   :  { %767 = shalt.err (!%p764_p8)
}
 0x357   :  { %s768_s28 = scalar_lea.hbm %s977_s10, 128 }
 0x358   :  { %p769_p9 = scmp.ne.s32.totalorder %s977_s10, %s768_s28  ;;  %p772_p10 = scmp.lt.u32.totalorder %s768_s28, %s977_s10 }
 0x35a   :  { %p774_p11 = pnand %p772_p10, %p769_p9 }
 0x35c   :  { %777 = shalt.err (!%p774_p11)
}
 0x35d   :  { %469 = dma.vmem_to_hbm [thread:$0]  %s467_s11, 128, %s977_s10, [#allocation4]  }
 0x35e   :  { %784 = dma.done.wait [#allocation4], 128  }
 0x35f   :  { %785 = vsyncadd [#allocation4], 4294967168 }
 0x360   :  { %473 = vsyncpa [#allocation3], 1 }
 0x361   :  { %474 = vsyncpa [#allocation6], 1 }
 0x362   :  { %475 = vsyncpa [#allocation9], 1 }
 0x363   :  { %476 = vsyncpa [#allocation4], 1 }

</bundles_post_ra>
